<compile_context>
chip_gen: v5e
topology: v5e:2x2
jax: 0.10.0
libtpu: 0.0.40
codegen_flags: <defaults>
</compile_context>

<pallas_src>
import math

import jax
import jax.numpy as jnp
from jax.experimental import pallas as pl
from jax.experimental.pallas import tpu as pltpu


def _affine_kernel(x_ref, g_ref, b_ref, o_ref):
    # Compute in f32 regardless of activation dtype (free for a mem-bound op),
    # then cast back to the output dtype. g/b broadcast implicitly (1, lanes).
    x = x_ref[...].astype(jnp.float32)
    o_ref[...] = (x * g_ref[...] + b_ref[...]).astype(o_ref.dtype)


def _target_tile_bytes():
    """Per-buffer tile budget keyed off the TPU generation (HBM-roofline driven)."""
    try:
        kind = jax.devices()[0].device_kind.lower()
    except Exception:
        return 2 << 20
    if "v7" in kind or "7x" in kind:
        return 6 << 20   # ~3.2 TB/s/TC HBM: amortize ~0.35us/step overhead to <10%
    if "v6" in kind:
        return 4 << 20   # 32 MiB scoped default holds the ~16 MiB 4-buffer footprint
    return 2 << 20       # v5e (and default): already ~93% overhead-free at 2 MiB


def _choose_tile_rows(rows, lanes, dtype_bytes, target_bytes):
    """Row tile that is sublane-packing aligned and roughly target_bytes big."""
    # Sub-32-bit dtypes pack along sublanes: bf16 -> 16-row multiples,
    # int8/fp8 -> 32-row multiples, f32 -> 8-row multiples.
    packing = max(1, 4 // max(1, dtype_bytes))
    align = 8 * packing
    tr = target_bytes // max(1, lanes * dtype_bytes)
    tr = max(align, (tr // align) * align)
    if tr >= rows:
        return rows  # full extent is always a legal block shape
    return tr


def affine(x, g, b, *, donate_x=False):
    """x: (B, N, D); g, b: (1, 1, D). Returns x * g + b in x.dtype.

    Set donate_x=True if the caller no longer needs x: the output then aliases
    x's HBM buffer via input_output_aliases, halving peak activation footprint.
    """
    B, N, D = x.shape
    assert g.shape == (1, 1, D) and b.shape == (1, 1, D)

    dtype = x.dtype
    dtype_bytes = jnp.dtype(dtype).itemsize
    # Params are applied in f32 inside the kernel (bit-accurate vs f32 params).
    g_flat = g.reshape(D).astype(jnp.float32)
    b_flat = b.reshape(D).astype(jnp.float32)

    total = B * N * D

    # Generalized lane-dense folding: pick lanes = lcm(D, 128) whenever the
    # flattened size divides evenly, so the lane dim is 128-aligned for any D
    # (e.g. 32, 96, 192, 320). g/b are tiled lanes//D times along lanes.
    lanes = math.lcm(D, 128)
    if total % lanes != 0:
        # Fall back: lane dim == full array dim (legal block shape), but stores
        # may be masked if D % 128 != 0 -- correct, just slower.
        lanes = D
    reps = lanes // D
    x2 = x.reshape(total // lanes, lanes)
    g2 = jnp.tile(g_flat, reps).reshape(1, lanes)
    b2 = jnp.tile(b_flat, reps).reshape(1, lanes)

    rows = x2.shape[0]
    tr = _choose_tile_rows(rows, lanes, dtype_bytes, _target_tile_bytes())
    grid = (pl.cdiv(rows, tr),)

    # Scoped-VMEM budget: 2x double-buffered x tile + 2x double-buffered out
    # tile + resident g/b, with headroom. Capped well under every generation's
    # physical VMEM (v7x 64 MiB, v5e/v6e 128 MiB).
    tile_bytes = tr * lanes * dtype_bytes
    footprint = 4 * tile_bytes + 2 * lanes * 4
    vmem_limit = int(min(48 << 20, max(32 << 20, footprint + (8 << 20))))

    extra_kwargs = {}
    if donate_x:
        extra_kwargs["input_output_aliases"] = {0: 0}  # out aliases x2

    out2 = pl.pallas_call(
        _affine_kernel,
        out_shape=jax.ShapeDtypeStruct((rows, lanes), dtype),
        grid_spec=pltpu.PrefetchScalarGridSpec(
            num_scalar_prefetch=0,
            grid=grid,
            in_specs=[
                pl.BlockSpec((tr, lanes), lambda i: (i, 0)),   # x row tile
                pl.BlockSpec((1, lanes), lambda i: (0, 0)),    # g (resident f32)
                pl.BlockSpec((1, lanes), lambda i: (0, 0)),    # b (resident f32)
            ],
            out_specs=pl.BlockSpec((tr, lanes), lambda i: (i, 0)),
        ),
        # TODO(synk): on v7x, evaluate dimension_semantics=(pltpu.CORE_PARALLEL,)
        # and confirm in xprof that both TensorCores stream row tiles; plain
        # "parallel" on a 1-D grid may leave one TC's DMA/HBM bandwidth idle.
        compiler_params=pltpu.CompilerParams(
            dimension_semantics=("parallel",),
            vmem_limit_bytes=vmem_limit,
        ),
        cost_estimate=pl.CostEstimate(
            flops=2 * total,
            transcendentals=0,
            bytes_accessed=2 * total * dtype_bytes + 2 * lanes * 4,
        ),
        **extra_kwargs,
    )(x2, g2, b2)

    return out2.reshape(B, N, D)


if __name__ == "__main__":
    key = jax.random.PRNGKey(0)

    # Case 1: module's small test shape (lane-folding path, D=32 -> lanes=128).
    B, N, D = 2, 8, 32
    x = jax.random.normal(key, (B, N, D), dtype=jnp.float32)
    g = jnp.ones((1, 1, D), dtype=jnp.float32)   # nn.Parameter(torch.ones)
    b = jnp.zeros((1, 1, D), dtype=jnp.float32)  # nn.Parameter(torch.zeros)
    out = jax.block_until_ready(affine(x, g, b))
    ref = x * g + b
    assert out.shape == (B, N, D)
    assert jnp.allclose(out, ref, atol=1e-6), "mismatch vs reference (D=32)"

    # Case 2: ResMLP-like hidden dim (D multiple of 128), non-trivial g/b.
    B2, N2, D2 = 2, 16, 384
    k1, k2, k3 = jax.random.split(key, 3)
    x2 = jax.random.normal(k1, (B2, N2, D2), dtype=jnp.float32)
    g2 = 1.0 + 0.1 * jax.random.normal(k2, (1, 1, D2), dtype=jnp.float32)
    b2 = 0.1 * jax.random.normal(k3, (1, 1, D2), dtype=jnp.float32)
    out2 = jax.block_until_ready(affine(x2, g2, b2))
    ref2 = x2 * g2 + b2
    assert out2.shape == (B2, N2, D2)
    assert jnp.allclose(out2, ref2, atol=1e-6), "mismatch vs reference (D=384)"

    # Case 3: D not a multiple of 128 (generalized fold: lcm(96,128)=384),
    # bf16 activations with f32 params, output buffer donated (reference is
    # computed BEFORE the donating call).
    B3, N3, D3 = 2, 16, 96
    k4, k5, k6 = jax.random.split(k3, 3)
    x3 = jax.random.normal(k4, (B3, N3, D3), dtype=jnp.bfloat16)
    g3 = 1.0 + 0.1 * jax.random.normal(k5, (1, 1, D3), dtype=jnp.float32)
    b3 = 0.1 * jax.random.normal(k6, (1, 1, D3), dtype=jnp.float32)
    ref3 = (x3.astype(jnp.float32) * g3 + b3).astype(jnp.bfloat16)
    out3 = jax.block_until_ready(affine(x3, g3, b3, donate_x=True))
    assert out3.shape == (B3, N3, D3)
    assert jnp.allclose(out3.astype(jnp.float32), ref3.astype(jnp.float32),
                        atol=2e-2), "mismatch vs reference (D=96, bf16)"

    print("KERNEL_OK")
</pallas_src>

<mosaic_0001>
module attributes {stable_mosaic.version = 11 : i64} {
  func.func @_affine_kernel(%arg0: i32, %arg1: memref<4x128xf32, #tpu.memory_space<vmem>>, %arg2: memref<1x128xf32, #tpu.memory_space<vmem>>, %arg3: memref<1x128xf32, #tpu.memory_space<vmem>>, %arg4: memref<4x128xf32, #tpu.memory_space<vmem>>) attributes {dimension_semantics = [#tpu.dimension_semantics<parallel>], iteration_bounds = array<i64: 1>, scalar_prefetch = 0 : i64, scratch_operands = 0 : i64, tpu.core_type = #tpu.core_type<tc>, window_params = [{transform_indices = @transform_0, window_bounds = array<i64: 4, 128>}, {pipeline_mode = #tpu.pipeline_mode<synchronous>, transform_indices = @transform_1, window_bounds = array<i64: 1, 128>}, {pipeline_mode = #tpu.pipeline_mode<synchronous>, transform_indices = @transform_2, window_bounds = array<i64: 1, 128>}, {transform_indices = @transform_3, window_bounds = array<i64: 4, 128>}]} {
    %c0 = arith.constant 0 : index
    %c0_0 = arith.constant 0 : index
    %0 = vector.load %arg1[%c0, %c0_0] : memref<4x128xf32, #tpu.memory_space<vmem>>, vector<4x128xf32>
    %c0_1 = arith.constant 0 : index
    %c0_2 = arith.constant 0 : index
    %1 = vector.load %arg2[%c0_1, %c0_2] : memref<1x128xf32, #tpu.memory_space<vmem>>, vector<1x128xf32>
    %2 = vector.broadcast %1 : vector<1x128xf32> to vector<4x128xf32>
    %3 = arith.mulf %0, %2 : vector<4x128xf32>
    %c0_3 = arith.constant 0 : index
    %c0_4 = arith.constant 0 : index
    %4 = vector.load %arg3[%c0_3, %c0_4] : memref<1x128xf32, #tpu.memory_space<vmem>>, vector<1x128xf32>
    %5 = vector.broadcast %4 : vector<1x128xf32> to vector<4x128xf32>
    %6 = arith.addf %3, %5 : vector<4x128xf32>
    %c0_5 = arith.constant 0 : index
    %c0_6 = arith.constant 0 : index
    %7 = vector.load %arg4[%c0_5, %c0_6] : memref<4x128xf32, #tpu.memory_space<vmem>>, vector<4x128xf32>
    tpu.vector_store %arg4[%c0_5, %c0_6], %6 {strides = array<i32>} : memref<4x128xf32, #tpu.memory_space<vmem>>, vector<4x128xf32>,
    return
  }
  func.func @transform_0(%arg0: i32) -> (i32, i32) {
    %c0_i32 = arith.constant 0 : i32
    %c0_i32_0 = arith.constant 0 : i32
    return %arg0, %c0_i32 : i32, i32
  }
  func.func @transform_1(%arg0: i32) -> (i32, i32) {
    %c0_i32 = arith.constant 0 : i32
    %c0_i32_0 = arith.constant 0 : i32
    %c0_i32_1 = arith.constant 0 : i32
    return %c0_i32, %c0_i32_0 : i32, i32
  }
  func.func @transform_2(%arg0: i32) -> (i32, i32) {
    %c0_i32 = arith.constant 0 : i32
    %c0_i32_0 = arith.constant 0 : i32
    %c0_i32_1 = arith.constant 0 : i32
    return %c0_i32, %c0_i32_0 : i32, i32
  }
  func.func @transform_3(%arg0: i32) -> (i32, i32) {
    %c0_i32 = arith.constant 0 : i32
    %c0_i32_0 = arith.constant 0 : i32
    return %arg0, %c0_i32 : i32, i32
  }
}

</mosaic_0001>

<bundles_post_ra>
// kernel: tpu_custom_call.1
= control target key start
LH: loop header
LB: loop body
LE: loop exit
PB: predicated region body
PF: predicated region fallthrough
CT: control target
= control target key end

     0   :  { %8 = vsyncpa [#allocation3], 0  ;;  %s191_s0 = inlined_call_operand.hbm [shape: f32[4,128], index: 0, kind: input, shape index: {}]   ;;  %s192_s1 = inlined_call_operand.hbm [shape: f32[1,128], index: 1, kind: input, shape index: {}]   ;;  %s193_s2 = inlined_call_operand.vmem [shape: f32[1,128], index: 2, kind: input, shape index: {}]   ;;  %s194_s3 = inlined_call_operand.hbm [shape: f32[4,128], index: 3, kind: output, shape index: {}]  }
   0x1   :  { %9 = vsyncpa [#allocation6], 0 }
   0x2   :  { %10 = vsyncpa [#allocation4], 0  ;;  %s16_s14 = sshll.u32 %s191_s0, 4  ;;  %s156_s15 = smov [#allocation2]   ;;  %s17_s14 = int_to_ptr.hbm [resolvable:$true] %s16_s14 }
   0x3   :  { %s18_s16 = sshll.u32 %s156_s15, 4  ;;  %s27_s19 = sshll.u32 %s192_s1, 4  ;;  %s19_s16 = int_to_ptr.vmem [resolvable:$true] %s18_s16  ;;  %s28_s19 = int_to_ptr.hbm [resolvable:$true] %s27_s19 }
   0x4   :  { %21 = dma.hbm_to_vmem [thread:$0]  %s17_s14, 64, %s19_s16, [#allocation3]  }
   0x5   :  { %s157_s20 = smov [#allocation5]  }
   0x6   :  { %s29_s21 = sshll.u32 %s157_s20, 4  ;;  %s30_s21 = int_to_ptr.vmem [resolvable:$true] %s29_s21 }
   0x7   :  { %32 = dma.hbm_to_vmem [thread:$0]  %s28_s19, 16, %s30_s21, [#allocation6]  }
   0x8   :  { %150 = dma.done.wait [#allocation3], 64  }
   0x9   :  { %151 = vsyncadd [#allocation3], 4294967232 }
   0xa   :  { %152 = dma.done.wait [#allocation6], 16  }
   0xb   :  { %153 = vsyncadd [#allocation6], 4294967280  ;;  %v43_v0 = vld [vmem:[#allocation2] sm:$0xf]  ;;  %v76_v1 = vld [vmem:[#allocation5] ss:$0 sm:$0xff] }
   0xc   :  { %v77_v2 = vld [vmem:[%s193_s2] ss:$0 sm:$0xff]  ;;  %s158_s23 = smov [#allocation7]   ;;  %s62_s26 = sshll.u32 %s194_s3, 4  ;;  %v48_v3 = vmul.f32 %v76_v1, %v43_v0  ;;  %s63_s26 = int_to_ptr.hbm [resolvable:$true] %s62_s26 }
   0xd   :  { %s60_s24 = sshll.u32 %s158_s23, 4  ;;  %s61_s24 = int_to_ptr.vmem [resolvable:$true] %s60_s24 }
   0xe   :  { %v53_v4 = vadd.f32 %v77_v2, %v48_v3 }
  0x10   :  { %54 = vst [vmem:[#allocation7] sm:$0xf] %v53_v4 }
  0x11   :  { %65 = dma.vmem_to_hbm [thread:$0]  %s61_s24, 64, %s63_s26, [#allocation4]  }
  0x12   :  { %154 = dma.done.wait [#allocation4], 64  }
  0x13   :  { %155 = vsyncadd [#allocation4], 4294967232 }
  0x14   :  { %70 = vsyncpa [#allocation3], 1 }
  0x15   :  { %71 = vsyncpa [#allocation6], 1 }
  0x16   :  { %72 = vsyncpa [#allocation4], 1 }

</bundles_post_ra>
